<compile_context>
chip_gen: v7x
topology: tpu7x:2x2x1
jax: 0.10.0
libtpu: 0.0.40
codegen_flags: <defaults>
</compile_context>

<pallas_src>
import jax
import jax.numpy as jnp
from jax.experimental import pallas as pl
from jax.experimental.pallas import tpu as pltpu  # noqa: F401  (not needed at this size)

# ---- config (small, consistent with the module) ----
B = 2            # batch
T = 8            # seq len == block_size
C = 32           # n_embd
H = 4            # n_head
HS = C // H      # head_size
HID = 4 * C      # FFN hidden (=128)
BT = B * T       # batch folded into sublanes (=16)
LN_EPS = 1e-5
NEG_INF = -1e30

# misc buffer row layout (f32, shape (MISC_ROWS, 128)):
#   rows 0..6 : ln1g, ln1b, ln2g, ln2b, bproj, b2 (lanes 0:C), b1 (lanes 0:HID)
#   rows 8..8+BT-1, lanes 0:BT : additive block-diagonal causal mask (0 / -1e30)
ROW_MASK = 8
MISC_ROWS = ROW_MASK + BT    # 24


def _layernorm(x, g, b):
    mu = jnp.mean(x, axis=-1, keepdims=True)
    var = jnp.mean((x - mu) ** 2, axis=-1, keepdims=True)
    return (x - mu) * jax.lax.rsqrt(var + LN_EPS) * g + b


def block_kernel(x_ref, w_qkv1_ref, w_pw2_ref, misc_ref, out_ref):
    x = x_ref[...]                                       # (BT, C) f32

    # ---- unpack misc (static ref slices; cheap) ----
    ln1g  = misc_ref[0:1, 0:C]
    ln1b  = misc_ref[1:2, 0:C]
    ln2g  = misc_ref[2:3, 0:C]
    ln2b  = misc_ref[3:4, 0:C]
    bproj = misc_ref[4:5, 0:C]
    b2    = misc_ref[5:6, 0:C]
    b1    = misc_ref[6:7, 0:HID]
    mask  = misc_ref[ROW_MASK:ROW_MASK + BT, 0:BT]       # (BT, BT) additive 0 / -1e30

    # ---- LN1 (f32) ----
    xn = _layernorm(x, ln1g, ln1b)

    # ---- fused QKV projection: one (BT,C)@(C,3C) bf16 matmul ----
    w_qkv = w_qkv1_ref[:, 0:3 * C]                       # (C, 3C) bf16
    qkv = jnp.dot(xn.astype(jnp.bfloat16), w_qkv,
                  preferred_element_type=jnp.float32)    # (BT, 3C) f32; scale folded in Wq

    # ---- multi-head causal self-attention (per-head lane slices) ----
    heads = []
    for h in range(H):
        q_h = qkv[:, h * HS:(h + 1) * HS].astype(jnp.bfloat16)          # (BT, HS)
        k_h = qkv[:, C + h * HS:C + (h + 1) * HS].astype(jnp.bfloat16)  # (BT, HS)
        v_h = qkv[:, 2 * C + h * HS:2 * C + (h + 1) * HS].astype(jnp.bfloat16)
        wei = jnp.einsum('qd,kd->qk', q_h, k_h,
                         preferred_element_type=jnp.float32)            # (BT, BT) f32
        wei = wei + mask                                                 # finite additive mask
        wei = wei - jnp.max(wei, axis=-1, keepdims=True)
        p = jnp.exp(wei)
        p = p * pl.reciprocal(jnp.sum(p, axis=-1, keepdims=True), approx=True)
        heads.append(jnp.dot(p.astype(jnp.bfloat16), v_h,
                             preferred_element_type=jnp.float32))        # (BT, HS) f32

    oh = jnp.concatenate(heads, axis=-1)                 # (BT, C) == concat over heads

    # ---- single output projection (K = C = 32) ----
    w_proj = w_pw2_ref[0:C, :]                           # (C, C) bf16
    sa = jnp.dot(oh.astype(jnp.bfloat16), w_proj,
                 preferred_element_type=jnp.float32) + bproj
    x1 = x + sa                                          # residual 1 (f32)

    # ---- LN2 + FFN ----
    xn2 = _layernorm(x1, ln2g, ln2b)
    w1 = w_qkv1_ref[:, 128:128 + HID]                    # (C, HID) bf16, lane-aligned
    h1 = jnp.dot(xn2.astype(jnp.bfloat16), w1,
                 preferred_element_type=jnp.float32) + b1
    h1 = jnp.maximum(h1, 0.0)
    w2 = w_pw2_ref[C:C + HID, :]                         # (HID, C) bf16
    ff = jnp.dot(h1.astype(jnp.bfloat16), w2,
                 preferred_element_type=jnp.float32) + b2

    out_ref[...] = (x1 + ff).astype(out_ref.dtype)       # residual 2


@jax.jit
def transformer_block(x, kparams):
    """x: (B, T, C); kparams: output of prepare_params()."""
    slab_a, slab_b, misc = kparams
    x2d = x.reshape(BT, C)
    out2d = pl.pallas_call(
        block_kernel,
        out_shape=jax.ShapeDtypeStruct((BT, C), x.dtype),
        # no grid: single invocation, ~50 KB total footprint, all weights DMA'd once
    )(x2d, slab_a, slab_b, misc)
    return out2d.reshape(x.shape)


def make_params(key):
    """Raw parameters in the same layout/semantics as the PyTorch module (pre-transposed to (in,out))."""
    ks = jax.random.split(key, 8)
    scale = 0.02
    ln1g = jnp.ones((1, C), jnp.float32)
    ln1b = jnp.zeros((1, C), jnp.float32)
    ln2g = jnp.ones((1, C), jnp.float32)
    ln2b = jnp.zeros((1, C), jnp.float32)
    wq = scale * jax.random.normal(ks[0], (C, C), jnp.float32)
    wk = scale * jax.random.normal(ks[1], (C, C), jnp.float32)
    wv = scale * jax.random.normal(ks[2], (C, C), jnp.float32)
    wproj = scale * jax.random.normal(ks[3], (C, C), jnp.float32)
    bproj = scale * jax.random.normal(ks[4], (1, C), jnp.float32)
    w1 = scale * jax.random.normal(ks[5], (C, HID), jnp.float32)
    b1 = scale * jax.random.normal(ks[6], (1, HID), jnp.float32)
    w2 = scale * jax.random.normal(ks[7], (HID, C), jnp.float32)
    b2 = jnp.zeros((1, C), jnp.float32)
    return (ln1g, ln1b, wq, wk, wv, wproj, bproj, ln2g, ln2b, w1, b1, w2, b2)


def prepare_params(params):
    """One-time constant packing into the kernel's fused bf16 layout.

    - fold 1/sqrt(HS) into Wq
    - slab_a (32, 256) bf16 = [ Wq*scale | Wk | Wv | pad32 | W1 ]   (W1 lane-aligned at 128)
    - slab_b (160, 32) bf16 = [ Wproj ; W2 ]                        (sublane-aligned rows)
    - misc   (24, 128) f32  = LN gamma/beta, biases, additive block-diag causal mask
    """
    (ln1g, ln1b, wq, wk, wv, wproj, bproj, ln2g, ln2b, w1, b1, w2, b2) = params
    att_scale = HS ** -0.5

    wqkv = jnp.concatenate([wq * att_scale, wk, wv], axis=1)        # (C, 3C)
    pad = jnp.zeros((C, 128 - 3 * C), jnp.float32)                  # (C, 32)
    slab_a = jnp.concatenate([wqkv, pad, w1], axis=1).astype(jnp.bfloat16)   # (32, 256)

    slab_b = jnp.concatenate([wproj, w2], axis=0).astype(jnp.bfloat16)       # (160, 32)

    misc = jnp.zeros((MISC_ROWS, 128), jnp.float32)
    misc = misc.at[0, :C].set(ln1g.reshape(-1))
    misc = misc.at[1, :C].set(ln1b.reshape(-1))
    misc = misc.at[2, :C].set(ln2g.reshape(-1))
    misc = misc.at[3, :C].set(ln2b.reshape(-1))
    misc = misc.at[4, :C].set(bproj.reshape(-1))
    misc = misc.at[5, :C].set(b2.reshape(-1))
    misc = misc.at[6, :HID].set(b1.reshape(-1))
    row = jnp.arange(BT)[:, None]
    col = jnp.arange(BT)[None, :]
    keep = (row >= col) & ((row // T) == (col // T))    # block-diagonal causal (batch folded)
    misc = misc.at[ROW_MASK:ROW_MASK + BT, :BT].set(
        jnp.where(keep, 0.0, NEG_INF).astype(jnp.float32))

    return (slab_a, slab_b, misc)


def reference_block(x, params):
    """Pure-JAX f32 reference mirroring the PyTorch forward (dropout = identity)."""
    (ln1g, ln1b, wq, wk, wv, wproj, bproj, ln2g, ln2b, w1, b1, w2, b2) = params
    xn = _layernorm(x, ln1g, ln1b)
    q = xn @ wq
    k = xn @ wk
    v = xn @ wv
    qh = q.reshape(B, T, H, HS).transpose(0, 2, 1, 3)
    kh = k.reshape(B, T, H, HS).transpose(0, 2, 1, 3)
    vh = v.reshape(B, T, H, HS).transpose(0, 2, 1, 3)
    wei = jnp.einsum("bhqd,bhkd->bhqk", qh, kh) * (HS ** -0.5)
    mask = jnp.tril(jnp.ones((T, T), bool))
    wei = jnp.where(mask, wei, -jnp.inf)
    wei = jax.nn.softmax(wei, axis=-1)
    out = jnp.einsum("bhqk,bhkd->bhqd", wei, vh).transpose(0, 2, 1, 3).reshape(B, T, C)
    x = x + out @ wproj + bproj
    xn2 = _layernorm(x, ln2g, ln2b)
    ff = jnp.maximum(xn2 @ w1 + b1, 0.0) @ w2 + b2
    return x + ff


if __name__ == "__main__":
    key = jax.random.PRNGKey(0)
    kx, kp = jax.random.split(key)
    x = jax.random.normal(kx, (B, T, C), jnp.float32)
    params = make_params(kp)
    kparams = prepare_params(params)

    out = transformer_block(x, kparams)
    jax.block_until_ready(out)

    ref = reference_block(x, params)
    assert out.shape == (B, T, C)
    # bf16 matmul inputs + approx softmax reciprocal give ~1e-3-level deviations
    # from the pure-f32 reference; residual path / LN / softmax stay in f32.
    assert jnp.allclose(out, ref, atol=2e-3, rtol=2e-3), "mismatch vs reference"

    print("KERNEL_OK")
</pallas_src>

<mosaic_0001>
module attributes {stable_mosaic.version = 11 : i64} {
  func.func @block_kernel(%arg0: memref<16x32xf32, #tpu.memory_space<vmem>>, %arg1: memref<32x256xbf16, #tpu.memory_space<vmem>>, %arg2: memref<160x32xbf16, #tpu.memory_space<vmem>>, %arg3: memref<24x128xf32, #tpu.memory_space<vmem>>, %arg4: memref<16x32xf32, #tpu.memory_space<vmem>>) attributes {dimension_semantics = [], scalar_prefetch = 0 : i64, scratch_operands = 0 : i64, tpu.core_type = #tpu.core_type<tc>} {
    %c0 = arith.constant 0 : index
    %c0_0 = arith.constant 0 : index
    %0 = vector.load %arg0[%c0, %c0_0] : memref<16x32xf32, #tpu.memory_space<vmem>>, vector<16x32xf32>
    %c0_1 = arith.constant 0 : index
    %c0_2 = arith.constant 0 : index
    %1 = vector.load %arg3[%c0_1, %c0_2] : memref<24x128xf32, #tpu.memory_space<vmem>>, vector<1x32xf32>
    %c1 = arith.constant 1 : index
    %c0_3 = arith.constant 0 : index
    %2 = vector.load %arg3[%c1, %c0_3] : memref<24x128xf32, #tpu.memory_space<vmem>>, vector<1x32xf32>
    %c2 = arith.constant 2 : index
    %c0_4 = arith.constant 0 : index
    %3 = vector.load %arg3[%c2, %c0_4] : memref<24x128xf32, #tpu.memory_space<vmem>>, vector<1x32xf32>
    %c3 = arith.constant 3 : index
    %c0_5 = arith.constant 0 : index
    %4 = vector.load %arg3[%c3, %c0_5] : memref<24x128xf32, #tpu.memory_space<vmem>>, vector<1x32xf32>
    %c4 = arith.constant 4 : index
    %c0_6 = arith.constant 0 : index
    %5 = vector.load %arg3[%c4, %c0_6] : memref<24x128xf32, #tpu.memory_space<vmem>>, vector<1x32xf32>
    %c5 = arith.constant 5 : index
    %c0_7 = arith.constant 0 : index
    %6 = vector.load %arg3[%c5, %c0_7] : memref<24x128xf32, #tpu.memory_space<vmem>>, vector<1x32xf32>
    %c6 = arith.constant 6 : index
    %c0_8 = arith.constant 0 : index
    %7 = vector.load %arg3[%c6, %c0_8] : memref<24x128xf32, #tpu.memory_space<vmem>>, vector<1x128xf32>
    %c8 = arith.constant 8 : index
    %c0_9 = arith.constant 0 : index
    %8 = vector.load %arg3[%c8, %c0_9] : memref<24x128xf32, #tpu.memory_space<vmem>>, vector<16x16xf32>
    %cst = arith.constant dense<0.000000e+00> : vector<16xf32>
    %9 = vector.multi_reduction <add>, %0, %cst [1] : vector<16x32xf32> to vector<16xf32>
    %10 = vector.shape_cast %9 : vector<16xf32> to vector<16x1xf32>
    %cst_10 = arith.constant 3.200000e+01 : f32
    %11 = vector.broadcast %cst_10 : f32 to vector<16x1xf32>
    %12 = arith.divf %10, %11 : vector<16x1xf32>
    %13 = vector.broadcast %12 : vector<16x1xf32> to vector<16x32xf32>
    %14 = arith.subf %0, %13 : vector<16x32xf32>
    %15 = arith.mulf %14, %14 : vector<16x32xf32>
    %cst_11 = arith.constant dense<0.000000e+00> : vector<16xf32>
    %16 = vector.multi_reduction <add>, %15, %cst_11 [1] : vector<16x32xf32> to vector<16xf32>
    %17 = vector.shape_cast %16 : vector<16xf32> to vector<16x1xf32>
    %cst_12 = arith.constant 3.200000e+01 : f32
    %18 = vector.broadcast %cst_12 : f32 to vector<16x1xf32>
    %19 = arith.divf %17, %18 : vector<16x1xf32>
    %20 = vector.broadcast %12 : vector<16x1xf32> to vector<16x32xf32>
    %21 = arith.subf %0, %20 : vector<16x32xf32>
    %cst_13 = arith.constant 9.99999974E-6 : f32
    %22 = vector.broadcast %cst_13 : f32 to vector<16x1xf32>
    %23 = arith.addf %19, %22 : vector<16x1xf32>
    %24 = math.rsqrt %23 : vector<16x1xf32>
    %25 = vector.broadcast %24 : vector<16x1xf32> to vector<16x32xf32>
    %26 = arith.mulf %21, %25 : vector<16x32xf32>
    %27 = vector.broadcast %1 : vector<1x32xf32> to vector<16x32xf32>
    %28 = arith.mulf %26, %27 : vector<16x32xf32>
    %29 = vector.broadcast %2 : vector<1x32xf32> to vector<16x32xf32>
    %30 = arith.addf %28, %29 : vector<16x32xf32>
    %c0_14 = arith.constant 0 : index
    %c0_15 = arith.constant 0 : index
    %31 = vector.load %arg1[%c0_14, %c0_15] : memref<32x256xbf16, #tpu.memory_space<vmem>>, vector<32x96xbf16>
    %32 = arith.truncf %30 : vector<16x32xf32> to vector<16x32xbf16>
    %cst_16 = arith.constant dense<0.000000e+00> : vector<16x96xf32>
    %33 = tpu.matmul %32, %31, %cst_16 {dimension_numbers = #tpu.dot_dimension_numbers<[1], [0], [0], [1], [0, 0, 1, 1], [], []>} : vector<16x32xbf16>, vector<32x96xbf16>, vector<16x96xf32> -> vector<16x96xf32>
    %34 = vector.extract_strided_slice %33 {offsets = [0, 0], sizes = [16, 8], strides = [1, 1]} : vector<16x96xf32> to vector<16x8xf32>
    %35 = arith.truncf %34 : vector<16x8xf32> to vector<16x8xbf16>
    %36 = vector.extract_strided_slice %33 {offsets = [0, 32], sizes = [16, 8], strides = [1, 1]} : vector<16x96xf32> to vector<16x8xf32>
    %37 = arith.truncf %36 : vector<16x8xf32> to vector<16x8xbf16>
    %38 = vector.extract_strided_slice %33 {offsets = [0, 64], sizes = [16, 8], strides = [1, 1]} : vector<16x96xf32> to vector<16x8xf32>
    %39 = arith.truncf %38 : vector<16x8xf32> to vector<16x8xbf16>
    "tpu.trace_start"() <{level = 10 : i32, message = "qd,kd->qk"}> : () -> ()
    %cst_17 = arith.constant dense<0.000000e+00> : vector<16x16xf32>
    %40 = tpu.matmul %35, %37, %cst_17 {dimension_numbers = #tpu.dot_dimension_numbers<[1], [1], [0], [0], [0, 0, 1, 0], [], []>} : vector<16x8xbf16>, vector<16x8xbf16>, vector<16x16xf32> -> vector<16x16xf32>
    "tpu.trace_stop"() : () -> ()
    %41 = arith.addf %40, %8 : vector<16x16xf32>
    %cst_18 = arith.constant dense<0xFF800000> : vector<16xf32>
    %42 = vector.multi_reduction <maximumf>, %41, %cst_18 [1] : vector<16x16xf32> to vector<16xf32>
    %43 = vector.shape_cast %42 : vector<16xf32> to vector<16x1xf32>
    %44 = vector.broadcast %43 : vector<16x1xf32> to vector<16x16xf32>
    %45 = arith.subf %41, %44 : vector<16x16xf32>
    %46 = math.exp %45 : vector<16x16xf32>
    %cst_19 = arith.constant dense<0.000000e+00> : vector<16xf32>
    %47 = vector.multi_reduction <add>, %46, %cst_19 [1] : vector<16x16xf32> to vector<16xf32>
    %48 = vector.shape_cast %47 : vector<16xf32> to vector<16x1xf32>
    %49 = tpu.reciprocal %48 {approx = true} : vector<16x1xf32> -> vector<16x1xf32>
    %50 = vector.broadcast %49 : vector<16x1xf32> to vector<16x16xf32>
    %51 = arith.mulf %46, %50 : vector<16x16xf32>
    %52 = arith.truncf %51 : vector<16x16xf32> to vector<16x16xbf16>
    %cst_20 = arith.constant dense<0.000000e+00> : vector<16x8xf32>
    %53 = tpu.matmul %52, %39, %cst_20 {dimension_numbers = #tpu.dot_dimension_numbers<[1], [0], [0], [1], [0, 0, 1, 1], [], []>} : vector<16x16xbf16>, vector<16x8xbf16>, vector<16x8xf32> -> vector<16x8xf32>
    %54 = vector.extract_strided_slice %33 {offsets = [0, 8], sizes = [16, 8], strides = [1, 1]} : vector<16x96xf32> to vector<16x8xf32>
    %55 = arith.truncf %54 : vector<16x8xf32> to vector<16x8xbf16>
    %56 = vector.extract_strided_slice %33 {offsets = [0, 40], sizes = [16, 8], strides = [1, 1]} : vector<16x96xf32> to vector<16x8xf32>
    %57 = arith.truncf %56 : vector<16x8xf32> to vector<16x8xbf16>
    %58 = vector.extract_strided_slice %33 {offsets = [0, 72], sizes = [16, 8], strides = [1, 1]} : vector<16x96xf32> to vector<16x8xf32>
    %59 = arith.truncf %58 : vector<16x8xf32> to vector<16x8xbf16>
    "tpu.trace_start"() <{level = 10 : i32, message = "qd,kd->qk"}> : () -> ()
    %cst_21 = arith.constant dense<0.000000e+00> : vector<16x16xf32>
    %60 = tpu.matmul %55, %57, %cst_21 {dimension_numbers = #tpu.dot_dimension_numbers<[1], [1], [0], [0], [0, 0, 1, 0], [], []>} : vector<16x8xbf16>, vector<16x8xbf16>, vector<16x16xf32> -> vector<16x16xf32>
    "tpu.trace_stop"() : () -> ()
    %61 = arith.addf %60, %8 : vector<16x16xf32>
    %cst_22 = arith.constant dense<0xFF800000> : vector<16xf32>
    %62 = vector.multi_reduction <maximumf>, %61, %cst_22 [1] : vector<16x16xf32> to vector<16xf32>
    %63 = vector.shape_cast %62 : vector<16xf32> to vector<16x1xf32>
    %64 = vector.broadcast %63 : vector<16x1xf32> to vector<16x16xf32>
    %65 = arith.subf %61, %64 : vector<16x16xf32>
    %66 = math.exp %65 : vector<16x16xf32>
    %cst_23 = arith.constant dense<0.000000e+00> : vector<16xf32>
    %67 = vector.multi_reduction <add>, %66, %cst_23 [1] : vector<16x16xf32> to vector<16xf32>
    %68 = vector.shape_cast %67 : vector<16xf32> to vector<16x1xf32>
    %69 = tpu.reciprocal %68 {approx = true} : vector<16x1xf32> -> vector<16x1xf32>
    %70 = vector.broadcast %69 : vector<16x1xf32> to vector<16x16xf32>
    %71 = arith.mulf %66, %70 : vector<16x16xf32>
    %72 = arith.truncf %71 : vector<16x16xf32> to vector<16x16xbf16>
    %cst_24 = arith.constant dense<0.000000e+00> : vector<16x8xf32>
    %73 = tpu.matmul %72, %59, %cst_24 {dimension_numbers = #tpu.dot_dimension_numbers<[1], [0], [0], [1], [0, 0, 1, 1], [], []>} : vector<16x16xbf16>, vector<16x8xbf16>, vector<16x8xf32> -> vector<16x8xf32>
    %74 = vector.extract_strided_slice %33 {offsets = [0, 16], sizes = [16, 8], strides = [1, 1]} : vector<16x96xf32> to vector<16x8xf32>
    %75 = arith.truncf %74 : vector<16x8xf32> to vector<16x8xbf16>
    %76 = vector.extract_strided_slice %33 {offsets = [0, 48], sizes = [16, 8], strides = [1, 1]} : vector<16x96xf32> to vector<16x8xf32>
    %77 = arith.truncf %76 : vector<16x8xf32> to vector<16x8xbf16>
    %78 = vector.extract_strided_slice %33 {offsets = [0, 80], sizes = [16, 8], strides = [1, 1]} : vector<16x96xf32> to vector<16x8xf32>
    %79 = arith.truncf %78 : vector<16x8xf32> to vector<16x8xbf16>
    "tpu.trace_start"() <{level = 10 : i32, message = "qd,kd->qk"}> : () -> ()
    %cst_25 = arith.constant dense<0.000000e+00> : vector<16x16xf32>
    %80 = tpu.matmul %75, %77, %cst_25 {dimension_numbers = #tpu.dot_dimension_numbers<[1], [1], [0], [0], [0, 0, 1, 0], [], []>} : vector<16x8xbf16>, vector<16x8xbf16>, vector<16x16xf32> -> vector<16x16xf32>
    "tpu.trace_stop"() : () -> ()
    %81 = arith.addf %80, %8 : vector<16x16xf32>
    %cst_26 = arith.constant dense<0xFF800000> : vector<16xf32>
    %82 = vector.multi_reduction <maximumf>, %81, %cst_26 [1] : vector<16x16xf32> to vector<16xf32>
    %83 = vector.shape_cast %82 : vector<16xf32> to vector<16x1xf32>
    %84 = vector.broadcast %83 : vector<16x1xf32> to vector<16x16xf32>
    %85 = arith.subf %81, %84 : vector<16x16xf32>
    %86 = math.exp %85 : vector<16x16xf32>
    %cst_27 = arith.constant dense<0.000000e+00> : vector<16xf32>
    %87 = vector.multi_reduction <add>, %86, %cst_27 [1] : vector<16x16xf32> to vector<16xf32>
    %88 = vector.shape_cast %87 : vector<16xf32> to vector<16x1xf32>
    %89 = tpu.reciprocal %88 {approx = true} : vector<16x1xf32> -> vector<16x1xf32>
    %90 = vector.broadcast %89 : vector<16x1xf32> to vector<16x16xf32>
    %91 = arith.mulf %86, %90 : vector<16x16xf32>
    %92 = arith.truncf %91 : vector<16x16xf32> to vector<16x16xbf16>
    %cst_28 = arith.constant dense<0.000000e+00> : vector<16x8xf32>
    %93 = tpu.matmul %92, %79, %cst_28 {dimension_numbers = #tpu.dot_dimension_numbers<[1], [0], [0], [1], [0, 0, 1, 1], [], []>} : vector<16x16xbf16>, vector<16x8xbf16>, vector<16x8xf32> -> vector<16x8xf32>
    %94 = vector.extract_strided_slice %33 {offsets = [0, 24], sizes = [16, 8], strides = [1, 1]} : vector<16x96xf32> to vector<16x8xf32>
    %95 = arith.truncf %94 : vector<16x8xf32> to vector<16x8xbf16>
    %96 = vector.extract_strided_slice %33 {offsets = [0, 56], sizes = [16, 8], strides = [1, 1]} : vector<16x96xf32> to vector<16x8xf32>
    %97 = arith.truncf %96 : vector<16x8xf32> to vector<16x8xbf16>
    %98 = vector.extract_strided_slice %33 {offsets = [0, 88], sizes = [16, 8], strides = [1, 1]} : vector<16x96xf32> to vector<16x8xf32>
    %99 = arith.truncf %98 : vector<16x8xf32> to vector<16x8xbf16>
    "tpu.trace_start"() <{level = 10 : i32, message = "qd,kd->qk"}> : () -> ()
    %cst_29 = arith.constant dense<0.000000e+00> : vector<16x16xf32>
    %100 = tpu.matmul %95, %97, %cst_29 {dimension_numbers = #tpu.dot_dimension_numbers<[1], [1], [0], [0], [0, 0, 1, 0], [], []>} : vector<16x8xbf16>, vector<16x8xbf16>, vector<16x16xf32> -> vector<16x16xf32>
    "tpu.trace_stop"() : () -> ()
    %101 = arith.addf %100, %8 : vector<16x16xf32>
    %cst_30 = arith.constant dense<0xFF800000> : vector<16xf32>
    %102 = vector.multi_reduction <maximumf>, %101, %cst_30 [1] : vector<16x16xf32> to vector<16xf32>
    %103 = vector.shape_cast %102 : vector<16xf32> to vector<16x1xf32>
    %104 = vector.broadcast %103 : vector<16x1xf32> to vector<16x16xf32>
    %105 = arith.subf %101, %104 : vector<16x16xf32>
    %106 = math.exp %105 : vector<16x16xf32>
    %cst_31 = arith.constant dense<0.000000e+00> : vector<16xf32>
    %107 = vector.multi_reduction <add>, %106, %cst_31 [1] : vector<16x16xf32> to vector<16xf32>
    %108 = vector.shape_cast %107 : vector<16xf32> to vector<16x1xf32>
    %109 = tpu.reciprocal %108 {approx = true} : vector<16x1xf32> -> vector<16x1xf32>
    %110 = vector.broadcast %109 : vector<16x1xf32> to vector<16x16xf32>
    %111 = arith.mulf %106, %110 : vector<16x16xf32>
    %112 = arith.truncf %111 : vector<16x16xf32> to vector<16x16xbf16>
    %cst_32 = arith.constant dense<0.000000e+00> : vector<16x8xf32>
    %113 = tpu.matmul %112, %99, %cst_32 {dimension_numbers = #tpu.dot_dimension_numbers<[1], [0], [0], [1], [0, 0, 1, 1], [], []>} : vector<16x16xbf16>, vector<16x8xbf16>, vector<16x8xf32> -> vector<16x8xf32>
    %114 = tpu.concatenate %53, %73, %93, %113 in 1 : vector<16x8xf32>, vector<16x8xf32>, vector<16x8xf32>, vector<16x8xf32> -> vector<16x32xf32>
    %c0_33 = arith.constant 0 : index
    %c0_34 = arith.constant 0 : index
    %115 = vector.load %arg2[%c0_33, %c0_34] : memref<160x32xbf16, #tpu.memory_space<vmem>>, vector<32x32xbf16>
    %116 = arith.truncf %114 : vector<16x32xf32> to vector<16x32xbf16>
    %cst_35 = arith.constant dense<0.000000e+00> : vector<16x32xf32>
    %117 = tpu.matmul %116, %115, %cst_35 {dimension_numbers = #tpu.dot_dimension_numbers<[1], [0], [0], [1], [0, 0, 1, 1], [], []>} : vector<16x32xbf16>, vector<32x32xbf16>, vector<16x32xf32> -> vector<16x32xf32>
    %118 = vector.broadcast %5 : vector<1x32xf32> to vector<16x32xf32>
    %119 = arith.addf %117, %118 : vector<16x32xf32>
    %120 = arith.addf %0, %119 : vector<16x32xf32>
    %cst_36 = arith.constant dense<0.000000e+00> : vector<16xf32>
    %121 = vector.multi_reduction <add>, %120, %cst_36 [1] : vector<16x32xf32> to vector<16xf32>
    %122 = vector.shape_cast %121 : vector<16xf32> to vector<16x1xf32>
    %cst_37 = arith.constant 3.200000e+01 : f32
    %123 = vector.broadcast %cst_37 : f32 to vector<16x1xf32>
    %124 = arith.divf %122, %123 : vector<16x1xf32>
    %125 = vector.broadcast %124 : vector<16x1xf32> to vector<16x32xf32>
    %126 = arith.subf %120, %125 : vector<16x32xf32>
    %127 = arith.mulf %126, %126 : vector<16x32xf32>
    %cst_38 = arith.constant dense<0.000000e+00> : vector<16xf32>
    %128 = vector.multi_reduction <add>, %127, %cst_38 [1] : vector<16x32xf32> to vector<16xf32>
    %129 = vector.shape_cast %128 : vector<16xf32> to vector<16x1xf32>
    %cst_39 = arith.constant 3.200000e+01 : f32
    %130 = vector.broadcast %cst_39 : f32 to vector<16x1xf32>
    %131 = arith.divf %129, %130 : vector<16x1xf32>
    %132 = vector.broadcast %124 : vector<16x1xf32> to vector<16x32xf32>
    %133 = arith.subf %120, %132 : vector<16x32xf32>
    %cst_40 = arith.constant 9.99999974E-6 : f32
    %134 = vector.broadcast %cst_40 : f32 to vector<16x1xf32>
    %135 = arith.addf %131, %134 : vector<16x1xf32>
    %136 = math.rsqrt %135 : vector<16x1xf32>
    %137 = vector.broadcast %136 : vector<16x1xf32> to vector<16x32xf32>
    %138 = arith.mulf %133, %137 : vector<16x32xf32>
    %139 = vector.broadcast %3 : vector<1x32xf32> to vector<16x32xf32>
    %140 = arith.mulf %138, %139 : vector<16x32xf32>
    %141 = vector.broadcast %4 : vector<1x32xf32> to vector<16x32xf32>
    %142 = arith.addf %140, %141 : vector<16x32xf32>
    %c0_41 = arith.constant 0 : index
    %c128 = arith.constant 128 : index
    %143 = vector.load %arg1[%c0_41, %c128] : memref<32x256xbf16, #tpu.memory_space<vmem>>, vector<32x128xbf16>
    %144 = arith.truncf %142 : vector<16x32xf32> to vector<16x32xbf16>
    %cst_42 = arith.constant dense<0.000000e+00> : vector<16x128xf32>
    %145 = tpu.matmul %144, %143, %cst_42 {dimension_numbers = #tpu.dot_dimension_numbers<[1], [0], [0], [1], [0, 0, 1, 1], [], []>} : vector<16x32xbf16>, vector<32x128xbf16>, vector<16x128xf32> -> vector<16x128xf32>
    %146 = vector.broadcast %7 : vector<1x128xf32> to vector<16x128xf32>
    %147 = arith.addf %145, %146 : vector<16x128xf32>
    %cst_43 = arith.constant 0.000000e+00 : f32
    %148 = vector.broadcast %cst_43 : f32 to vector<16x128xf32>
    %149 = arith.maximumf %147, %148 : vector<16x128xf32>
    %c32 = arith.constant 32 : index
    %c0_44 = arith.constant 0 : index
    %150 = vector.load %arg2[%c32, %c0_44] : memref<160x32xbf16, #tpu.memory_space<vmem>>, vector<128x32xbf16>
    %151 = arith.truncf %149 : vector<16x128xf32> to vector<16x128xbf16>
    %cst_45 = arith.constant dense<0.000000e+00> : vector<16x32xf32>
    %152 = tpu.matmul %151, %150, %cst_45 {dimension_numbers = #tpu.dot_dimension_numbers<[1], [0], [0], [1], [0, 0, 1, 1], [], []>} : vector<16x128xbf16>, vector<128x32xbf16>, vector<16x32xf32> -> vector<16x32xf32>
    %153 = vector.broadcast %6 : vector<1x32xf32> to vector<16x32xf32>
    %154 = arith.addf %152, %153 : vector<16x32xf32>
    %155 = arith.addf %120, %154 : vector<16x32xf32>
    %c0_46 = arith.constant 0 : index
    %c0_47 = arith.constant 0 : index
    %156 = vector.load %arg4[%c0_46, %c0_47] : memref<16x32xf32, #tpu.memory_space<vmem>>, vector<16x32xf32>
    tpu.vector_store %arg4[%c0_46, %c0_47], %155 {strides = array<i32>} : memref<16x32xf32, #tpu.memory_space<vmem>>, vector<16x32xf32>,
    return
  }
}

</mosaic_0001>

<bundles_post_ra>
// kernel: transformer_block.1
= control target key start
LH: loop header
LB: loop body
LE: loop exit
PB: predicated region body
PF: predicated region fallthrough
CT: control target
= control target key end

     0   :  { %vm30_vm0 = vcmask 261120   ;;  %s1476_s0 = inlined_call_operand.vmem [shape: f32[16,32], index: 0, kind: input, shape index: {}]   ;;  %s1477_s1 = inlined_call_operand.vmem [shape: bf16[32,256], index: 1, kind: input, shape index: {}]   ;;  %s1478_s2 = inlined_call_operand.vmem [shape: bf16[160,32], index: 2, kind: input, shape index: {}]   ;;  %s1479_s3 = inlined_call_operand.vmem [shape: f32[24,128], index: 3, kind: input, shape index: {}]   ;;  %s1480_s4 = inlined_call_operand.hbm [shape: f32[16,32], index: 4, kind: output, shape index: {}]  }
   0x1   :  { %v1265_v0 = vld [vmem:[%s1476_s0] sm:$0xff]  ;;  %v1270_v1 = vld [vmem:[%s1476_s0 + $0x8] sm:$0xff] }
   0x2   :  { %v31_v2 = vsel %vm30_vm0, %v1265_v0, 0.0  ;;  %v34_v3 = vsel %vm30_vm0, %v1270_v1, 0.0 }
   0x3   :  { %32 = vadd.xlane.f32.xlu0 %v31_v2 }
   0x7   :  { %35 = vadd.xlane.f32.xlu0 %v34_v3 }
   0x8   :  { %9 = vsyncpa [#allocation3], 0  ;;  %v1141_v14 = vld [vmem:[%s1477_s1] ss:$8 sps:$4 sm:$0xff]   ;;  %v1219_v15 = vmov 0.0   ;;  %vm1220_vm1 = vmmov 0  }
   0x9   :  { %1016 = vmatprep.subr.bf16.mxu0 %v1219_v15  ;;  %1036 = vmatprep.subr.bf16.mxu1 %v1219_v15  ;;  %v1142_v16 = vld [vmem:[%s1477_s1 + $0x10] ss:$8 sps:$4 sm:$0xff]   ;;  %v950_v25 = vld [vmem:[%s1479_s3] ss:$0 sm:$0xff]  ;;  %v951_v29 = vld [vmem:[%s1479_s3 + $0x1] ss:$0 sm:$0xff] }
   0xa   :  { %1017 = vmatpush3.bf16.msra.mxu0 %v1141_v14  ;;  %1020 = vmatprep.mubr.msk.bf16.mxu0 %vm1220_vm1, %v1219_v15  ;;  %s1221_s26 = smov 88   ;;  %s1222_s27 = smov 96   ;;  %vm135_vm2 = vcmask 64512   ;;  %v28_v50 = vld [vmem:[%s1479_s3 + $0x8] sm:$0xff]  ;;  %v29_v53 = vld [vmem:[%s1479_s3 + $0x10] sm:$0xff]  ;;  %vm183_vm3 = vcmask 130048  }
   0xb   :  { %1018 = vmatprep.subr.bf16.mxu0 %v1219_v15  ;;  %1038 = vmatprep.mubr.msk.bf16.mxu1 %vm1220_vm1, %v1219_v15  ;;  %s1223_s28 = smov 120   ;;  %s1224_s29 = smov 112   ;;  %vm645_vm4 = vcmask 195584  }
   0xc   :  { %s1225_s30 = smov 80   ;;  %s1226_s5 = smov 104  }
   0xd   :  { %s1227_s6 = smov 72   ;;  %s1228_s11 = smov 64  }
   0xe   :  { %1019 = vmatpush3.bf16.msra.mxu0 %v1142_v16  ;;  %s1229_s12 = smov 48   ;;  %s1230_s13 = smov 40  }
   0xf   :  { %1024 = vmatprep.subr.bf16.mxu0 %v1219_v15  ;;  %s1231_s14 = smov 56   ;;  %s1232_s17 = smov 8  }
  0x10   :  { %s1233_s19 = smov 16   ;;  %s1234_s20 = smov 24  }
  0x90   :  { %v33_v4 = vpop.xlane.xlu0 %32 }
  0x91   :  { %v38_v5 = vmul.f32 0.03125, %v33_v4 }
  0x93   :  { %v40_v6 = vsub.f32 %v1265_v0, %v38_v5 }
  0x94   :  { %v36_v7 = vpop.xlane.xlu0 %35 }
  0x95   :  { %v39_v8 = vmul.f32 0.03125, %v36_v7  ;;  %v42_v9 = vmul.f32 %v40_v6, %v40_v6 }
  0x97   :  { %v41_v10 = vsub.f32 %v1270_v1, %v39_v8  ;;  %v44_v11 = vsel %vm30_vm0, %v42_v9, 0.0 }
  0x98   :  { %45 = vadd.xlane.f32.xlu1 %v44_v11 }
  0x99   :  { %v43_v12 = vmul.f32 %v41_v10, %v41_v10 }
  0x9b   :  { %v47_v13 = vsel %vm30_vm0, %v43_v12, 0.0 }
  0x9c   :  { %48 = vadd.xlane.f32.xlu1 %v47_v13 }
 0x125   :  { %v46_v17 = vpop.xlane.xlu1 %45 }
 0x126   :  { %v50_v18 = vmul.f32 0.03125, %v46_v17 }
 0x128   :  { %v52_v19 = vadd.f32 1e-05, %v50_v18 }
 0x129   :  { %v49_v20 = vpop.xlane.xlu1 %48 }
 0x12a   :  { %1155 = vrsqrt.f32 %v52_v19  ;;  %v51_v21 = vmul.f32 0.03125, %v49_v20 }
 0x12c   :  { %v53_v22 = vadd.f32 1e-05, %v51_v21 }
 0x12e   :  { %1157 = vrsqrt.f32 %v53_v22 }
 0x134   :  { %v1156_v23 = vpop.eup %1155 }
 0x135   :  { %v56_v24 = vmul.f32 %v1156_v23, %v40_v6 }
 0x137   :  { %v62_v28 = vmul.f32 %v950_v25, %v56_v24 }
 0x138   :  { %v1158_v26 = vpop.eup %1157 }
 0x139   :  { %v57_v27 = vmul.f32 %v1158_v26, %v41_v10  ;;  %v68_v31 = vadd.f32 %v951_v29, %v62_v28 }
 0x13b   :  { %v63_v30 = vmul.f32 %v950_v25, %v57_v27 }
 0x13d   :  { %v69_v32 = vadd.f32 %v951_v29, %v63_v30 }
 0x13f   :  { %v74_v33 = vpack.c.bf16 %v69_v32, %v68_v31 }
 0x141   :  { %1021 = vmatmul.mubr.msk.bf16.vlgmr.msra.gmra.mrb[0].mxu0 %vm30_vm0, %v74_v33 }
 0x142   :  { %1026 = vmatprep.mubr.msk.bf16.mxu0 %vm1220_vm1, %v1219_v15 }
 0x214   :  { %v124_v34 = vpop.f32.mrb[0].mxu0 }
 0x215   :  { %v1022_v35 = vpop.f32.mrb[1].mxu0 }
 0x216   :  { %v127_v36 = vpop.f32.mrb[2].mxu0 }
 0x217   :  { %v1303_v37 = vpack.c.bf16 %v127_v36, %v124_v34  ;;  %v1023_v38 = vpop.f32.mrb[3].mxu0 }
 0x219   :  { %256 = vrot.lane.b32.xlu1 %v1303_v37, %s1221_s26  ;;  %133 = vrot.lane.b32.xlu0 %v1303_v37, %s1222_s27 }
 0x21d   :  { %254 = vrot.lane.b32.xlu1 %v1303_v37, %s1223_s28  ;;  %375 = vrot.lane.b32.xlu0 %v1303_v37, %s1224_s29 }
 0x221   :  { %377 = vrot.lane.b32.xlu1 %v1303_v37, %s1225_s30  ;;  %496 = vrot.lane.b32.xlu0 %v1303_v37, %s1226_s5 }
 0x225   :  { %498 = vrot.lane.b32.xlu1 %v1303_v37, %s1227_s6 }
 0x28b   :  { %v257_v39 = vpop.permute.xlu1 %256  ;;  %v134_v40 = vpop.permute.xlu0 %133 }
 0x28c   :  { %v140_v41 = vsel %vm135_vm2, %v134_v40, 0  ;;  %v262_v42 = vsel %vm135_vm2, %v257_v39, 0 }
 0x28d   :  { %1025 = vmatpush3.bf16.xpose.msra.mxu0 %v140_v41  ;;  %1037 = vmatpush3.bf16.xpose.msra.mxu1 %v262_v42 }
 0x28e   :  { %1048 = vmatprep.subr.bf16.mxu1 %v1219_v15  ;;  %1030 = vmatprep.subr.bf16.mxu0 %v1219_v15 }
 0x28f   :  { %v255_v43 = vpop.permute.xlu1 %254  ;;  %v376_v47 = vpop.permute.xlu0 %375 }
 0x293   :  { %v378_v44 = vpop.permute.xlu1 %377  ;;  %v497_v49 = vpop.permute.xlu0 %496 }
 0x294   :  { %v383_v45 = vsel %vm135_vm2, %v378_v44, 0  ;;  %1027 = vmatmul.mubr.msk.bf16.vlgmr.msra.gmra.mrb[4].mxu0 %vm135_vm2, %v1303_v37  ;;  %1039 = vmatmul.mubr.msk.bf16.vlgmr.msra.gmra.mrb[0].mxu1 %vm135_vm2, %v255_v43 }
 0x295   :  { %1049 = vmatpush3.bf16.xpose.msra.mxu1 %v383_v45  ;;  %1050 = vmatprep.mubr.msk.bf16.mxu1 %vm1220_vm1, %v1219_v15 }
 0x296   :  { %1060 = vmatprep.subr.bf16.mxu1 %v1219_v15  ;;  %1032 = vmatprep.mubr.msk.bf16.mxu0 %vm1220_vm1, %v1219_v15 }
 0x297   :  { %v499_v46 = vpop.permute.xlu1 %498 }
 0x298   :  { %v504_v48 = vsel %vm135_vm2, %v499_v46, 0 }
 0x29c   :  { %1051 = vmatmul.mubr.msk.bf16.vlgmr.msra.gmra.mrb[4].mxu1 %vm135_vm2, %v376_v47 }
 0x29d   :  { %1061 = vmatpush3.bf16.xpose.msra.mxu1 %v504_v48  ;;  %1062 = vmatprep.mubr.msk.bf16.mxu1 %vm1220_vm1, %v1219_v15 }
 0x29e   :  { %1072 = vmatprep.subr.bf16.mxu1 %v1219_v15 }
 0x2a4   :  { %1063 = vmatmul.mubr.msk.bf16.vlgmr.msra.gmra.mrb[8].mxu1 %vm135_vm2, %v497_v49 }
 0x2a5   :  { %1076 = vmatprep.mubr.msk.bf16.mxu1 %vm1220_vm1, %v1219_v15 }
 0x367   :  { %v176_v51 = vpop.f32.mrb[4].mxu0  ;;  %v298_v52 = vpop.f32.mrb[0].mxu1 }
 0x368   :  { %v177_v54 = vadd.f32 %v176_v51, %v28_v50  ;;  %v1028_v55 = vpop.f32.mrb[5].mxu0  ;;  %v1040_v56 = vpop.f32.mrb[1].mxu1  ;;  %v299_v63 = vadd.f32 %v298_v52, %v28_v50 }
 0x369   :  { %v179_v57 = vpop.f32.mrb[6].mxu0  ;;  %v301_v58 = vpop.f32.mrb[2].mxu1 }
 0x36a   :  { %v180_v59 = vadd.f32 %v179_v57, %v29_v53  ;;  %v1029_v60 = vpop.f32.mrb[7].mxu0  ;;  %v1041_v61 = vpop.f32.mrb[3].mxu1  ;;  %v184_v62 = vsel %vm183_vm3, %v177_v54, -inf  ;;  %v302_v4 = vadd.f32 %v301_v58, %v29_v53  ;;  %v305_v7 = vsel %vm183_vm3, %v299_v63, -inf }
 0x36b   :  { %185 = vmax.xlane.f32.xlu1 %v184_v62 }
 0x36c   :  { %v187_v2 = vsel %vm183_vm3, %v180_v59, -inf  ;;  %v308_v12 = vsel %vm183_vm3, %v302_v4, -inf }
 0x36d   :  { %188 = vmax.xlane.f32.xlu0 %v187_v2 }
 0x36f   :  { %v419_v3 = vpop.f32.mrb[4].mxu1 }
 0x370   :  { %v420_v5 = vadd.f32 %v419_v3, %v28_v50  ;;  %v1052_v6 = vpop.f32.mrb[5].mxu1 }
 0x371   :  { %v422_v8 = vpop.f32.mrb[6].mxu1  ;;  %306 = vmax.xlane.f32.xlu0 %v305_v7 }
 0x372   :  { %v1053_v9 = vpop.f32.mrb[7].mxu1  ;;  %v426_v10 = vsel %vm183_vm3, %v420_v5, -inf  ;;  %v423_v11 = vadd.f32 %v422_v8, %v29_v53 }
 0x373   :  { %427 = vmax.xlane.f32.xlu1 %v426_v10 }
 0x374   :  { %v429_v17 = vsel %vm183_vm3, %v423_v11, -inf }
 0x375   :  { %309 = vmax.xlane.f32.xlu0 %v308_v12 }
 0x377   :  { %v540_v13 = vpop.f32.mrb[8].mxu1 }
 0x378   :  { %v541_v14 = vadd.f32 %v540_v13, %v28_v50  ;;  %v1064_v16 = vpop.f32.mrb[9].mxu1 }
 0x379   :  { %v543_v18 = vpop.f32.mrb[10].mxu1  ;;  %430 = vmax.xlane.f32.xlu0 %v429_v17 }
 0x37a   :  { %v544_v19 = vadd.f32 %v543_v18, %v29_v53  ;;  %v1065_v20 = vpop.f32.mrb[11].mxu1  ;;  %v547_v21 = vsel %vm183_vm3, %v541_v14, -inf }
 0x37b   :  { %548 = vmax.xlane.f32.xlu1 %v547_v21 }
 0x37c   :  { %v550_v22 = vsel %vm183_vm3, %v544_v19, -inf }
 0x37d   :  { %551 = vmax.xlane.f32.xlu0 %v550_v22 }
 0x38c   :  { %207 = vrot.lane.b32.xlu1 %v1303_v37, %s1228_s11 }
 0x3f8   :  { %v186_v23 = vpop.xlane.xlu1 %185 }
 0x3f9   :  { %v190_v24 = vsub.f32 %v177_v54, %v186_v23 }
 0x3fa   :  { %v189_v25 = vpop.xlane.xlu0 %188 }
 0x3fb   :  { %v192_v26 = vmul.f32 1.442695, %v190_v24  ;;  %v191_v27 = vsub.f32 %v180_v59, %v189_v25 }
 0x3fd   :  { %1159 = vpow2.f32 %v192_v26  ;;  %v194_v28 = vmul.f32 1.442695, %v191_v27 }
 0x3fe   :  { %v307_v29 = vpop.xlane.xlu0 %306 }
 0x3ff   :  { %1161 = vpow2.f32 %v194_v28  ;;  %v311_v30 = vsub.f32 %v299_v63, %v307_v29 }
 0x400   :  { %v428_v31 = vpop.xlane.xlu1 %427 }
 0x401   :  { %v313_v32 = vmul.f32 1.442695, %v311_v30  ;;  %v432_v33 = vsub.f32 %v420_v5, %v428_v31 }
 0x402   :  { %v310_v34 = vpop.xlane.xlu0 %309 }
 0x403   :  { %1163 = vpow2.f32 %v313_v32  ;;  %v434_v35 = vmul.f32 1.442695, %v432_v33  ;;  %v312_v36 = vsub.f32 %v302_v4, %v310_v34 }
 0x405   :  { %1165 = vpow2.f32 %v434_v35  ;;  %v315_v38 = vmul.f32 1.442695, %v312_v36 }
 0x406   :  { %v431_v39 = vpop.xlane.xlu0 %430 }
 0x407   :  { %v1160_v40 = vpop.eup %1159  ;;  %1167 = vpow2.f32 %v315_v38  ;;  %v433_v41 = vsub.f32 %v423_v11, %v431_v39 }
 0x408   :  { %v549_v42 = vpop.xlane.xlu1 %548  ;;  %v196_v43 = vsel %vm183_vm3, %v1160_v40, 0.0 }
 0x409   :  { %v1162_v44 = vpop.eup %1161  ;;  %v436_v45 = vmul.f32 1.442695, %v433_v41  ;;  %v553_v46 = vsub.f32 %v541_v14, %v549_v42  ;;  %197 = vadd.xlane.f32.xlu1 %v196_v43  ;;  %v1143_v42 = vld [vmem:[%s1478_s2] sm:$0xff]  }
 0x40a   :  { %v552_v47 = vpop.xlane.xlu0 %551  ;;  %v199_v48 = vsel %vm183_vm3, %v1162_v44, 0.0  ;;  %1073 = vmatpush3.bf16.msra.mxu1 %v1143_v42 }
 0x40b   :  { %1169 = vpow2.f32 %v436_v45  ;;  %v555_v49 = vmul.f32 1.442695, %v553_v46  ;;  %v554_v50 = vsub.f32 %v544_v19, %v552_v47  ;;  %200 = vadd.xlane.f32.xlu0 %v199_v48  ;;  %1074 = vmatprep.subr.bf16.mxu1 %v1219_v15  ;;  %v1144_v47 = vld [vmem:[%s1478_s2 + $0x8] sm:$0xff]  }
 0x40c   :  { %v208_v51 = vpop.permute.xlu1 %207 }
 0x40d   :  { %v1164_v52 = vpop.eup %1163  ;;  %1171 = vpow2.f32 %v555_v49  ;;  %v557_v53 = vmul.f32 1.442695, %v554_v50  ;;  %1031 = vmatpush3.bf16.msra.mxu0 %v208_v51 }
 0x40e   :  { %v317_v54 = vsel %vm183_vm3, %v1164_v52, 0.0  ;;  %1042 = vmatprep.subr.bf16.mxu0 %v1219_v15  ;;  %1075 = vmatpush3.bf16.msra.mxu1 %v1144_v47 }
 0x40f   :  { %v1166_v55 = vpop.eup %1165  ;;  %1173 = vpow2.f32 %v557_v53  ;;  %318 = vadd.xlane.f32.xlu1 %v317_v54  ;;  %1088 = vmatprep.subr.bf16.mxu1 %v1219_v15 }
 0x410   :  { %v438_v57 = vsel %vm183_vm3, %v1166_v55, 0.0 }
 0x411   :  { %v1168_v56 = vpop.eup %1167 }
 0x412   :  { %v320_v58 = vsel %vm183_vm3, %v1168_v56, 0.0 }
 0x413   :  { %439 = vadd.xlane.f32.xlu1 %v438_v57  ;;  %321 = vadd.xlane.f32.xlu0 %v320_v58 }
 0x415   :  { %v1170_v59 = vpop.eup %1169 }
 0x416   :  { %v441_v60 = vsel %vm183_vm3, %v1170_v59, 0.0 }
 0x417   :  { %v1172_v61 = vpop.eup %1171  ;;  %442 = vadd.xlane.f32.xlu0 %v441_v60 }
 0x418   :  { %v559_v62 = vsel %vm183_vm3, %v1172_v61, 0.0 }
 0x419   :  { %v1174_v63 = vpop.eup %1173  ;;  %560 = vadd.xlane.f32.xlu1 %v559_v62 }
 0x41a   :  { %v562_v2 = vsel %vm183_vm3, %v1174_v63, 0.0 }
 0x41b   :  { %563 = vadd.xlane.f32.xlu0 %v562_v2 }
 0x42a   :  { %449 = vrot.lane.b32.xlu1 %v1303_v37, %s1229_s12 }
 0x42e   :  { %570 = vrot.lane.b32.xlu1 %v1303_v37, %s1230_s13 }
 0x431   :  { %328 = vrot.lane.b32.xlu0 %v1303_v37, %s1231_s14 }
 0x496   :  { %v198_v3 = vpop.xlane.xlu1 %197 }
 0x497   :  { %1175 = vrcp.f32 %v198_v3 }
 0x498   :  { %v201_v4 = vpop.xlane.xlu0 %200 }
 0x499   :  { %1177 = vrcp.f32 %v201_v4 }
 0x49c   :  { %v319_v5 = vpop.xlane.xlu1 %318 }
 0x49d   :  { %1179 = vrcp.f32 %v319_v5 }
 0x4a0   :  { %v322_v6 = vpop.xlane.xlu0 %321  ;;  %v440_v12 = vpop.xlane.xlu1 %439 }
 0x4a1   :  { %v1176_v7 = vpop.eup %1175  ;;  %1181 = vrcp.f32 %v322_v6 }
 0x4a2   :  { %v204_v9 = vmul.f32 %v1176_v7, %v1160_v40 }
 0x4a3   :  { %v1178_v8 = vpop.eup %1177 }
 0x4a4   :  { %v205_v10 = vmul.f32 %v1178_v8, %v1162_v44  ;;  %v443_v11 = vpop.xlane.xlu0 %442 }
 0x4a5   :  { %1183 = vrcp.f32 %v443_v11 }
 0x4a6   :  { %v206_v13 = vpack.c.bf16 %v205_v10, %v204_v9  ;;  %1185 = vrcp.f32 %v440_v12  ;;  %v561_v16 = vpop.xlane.xlu1 %560  ;;  %v963_v10 = vld [vmem:[%s1479_s3 + $0x4] ss:$0 sm:$0xff] }
 0x4a7   :  { %v1180_v14 = vpop.eup %1179 }
 0x4a8   :  { %1033 = vmatmul.mubr.msk.bf16.vlgmr.msra.gmra.mrb[8].mxu0 %vm183_vm3, %v206_v13  ;;  %v564_v37 = vpop.xlane.xlu0 %563  ;;  %v325_v19 = vmul.f32 %v1180_v14, %v1164_v52 }
 0x4a9   :  { %1044 = vmatprep.mubr.msk.bf16.mxu0 %vm1220_vm1, %v1219_v15  ;;  %1187 = vrcp.f32 %v564_v37 }
 0x4aa   :  { %1189 = vrcp.f32 %v561_v16  ;;  %v450_v23 = vpop.permute.xlu1 %449 }
 0x4ab   :  { %v1182_v17 = vpop.eup %1181 }
 0x4ac   :  { %v329_v18 = vpop.permute.xlu0 %328  ;;  %v326_v20 = vmul.f32 %v1182_v17, %v1168_v56 }
 0x4ad   :  { %1043 = vmatpush3.bf16.msra.mxu0 %v329_v18 }
 0x4ae   :  { %1054 = vmatprep.subr.bf16.mxu0 %v1219_v15  ;;  %v327_v21 = vpack.c.bf16 %v326_v20, %v325_v19  ;;  %v571_v29 = vpop.permute.xlu1 %570 }
 0x4af   :  { %v1184_v22 = vpop.eup %1183 }
 0x4b0   :  { %1045 = vmatmul.mubr.msk.bf16.vlgmr.msra.gmra.mrb[12].mxu0 %vm183_vm3, %v327_v21  ;;  %v1186_v24 = vpop.eup %1185  ;;  %v447_v25 = vmul.f32 %v1184_v22, %v1170_v59 }
 0x4b1   :  { %1055 = vmatpush3.bf16.msra.mxu0 %v450_v23  ;;  %1056 = vmatprep.mubr.msk.bf16.mxu0 %vm1220_vm1, %v1219_v15  ;;  %v446_v26 = vmul.f32 %v1186_v24, %v1166_v55 }
 0x4b2   :  { %1066 = vmatprep.subr.bf16.mxu0 %v1219_v15 }
 0x4b3   :  { %v448_v27 = vpack.c.bf16 %v447_v25, %v446_v26  ;;  %v1188_v28 = vpop.eup %1187 }
 0x4b4   :  { %v1190_v30 = vpop.eup %1189  ;;  %v568_v31 = vmul.f32 %v1188_v28, %v1174_v63 }
 0x4b5   :  { %v567_v32 = vmul.f32 %v1190_v30, %v1172_v61  ;;  %v1146_v30 = vld [vmem:[%s1477_s1 + $0x14] ss:$8 sps:$4 sm:$0xff]  }
 0x4b7   :  { %v569_v33 = vpack.c.bf16 %v568_v31, %v567_v32  ;;  %v1147_v31 = vld [vmem:[%s1478_s2 + $0x10] sm:$0xff]   ;;  %v1148_v32 = vld [vmem:[%s1478_s2 + $0x18] sm:$0xff]  }
 0x4b8   :  { %1057 = vmatmul.mubr.msk.bf16.vlgmr.msra.gmra.mrb[16].mxu0 %vm183_vm3, %v448_v27 }
 0x4b9   :  { %1067 = vmatpush3.bf16.msra.mxu0 %v571_v29  ;;  %1068 = vmatprep.mubr.msk.bf16.mxu0 %vm1220_vm1, %v1219_v15  ;;  %v1145_v29 = vld [vmem:[%s1477_s1 + $0x4] ss:$8 sps:$4 sm:$0xff]  }
 0x4ba   :  { %1080 = vmatprep.subr.bf16.mxu0 %v1219_v15 }
 0x4c0   :  { %1069 = vmatmul.mubr.msk.bf16.vlgmr.msra.gmra.mrb[20].mxu0 %vm183_vm3, %v569_v33  ;;  %v1149_v33 = vld [vmem:[%s1478_s2 + $0x20] sm:$0xff]  }
 0x4c1   :  { %1084 = vmatprep.mubr.msk.bf16.mxu0 %vm1220_vm1, %v1219_v15  ;;  %1081 = vmatpush3.bf16.msra.mxu0 %v1145_v29 }
 0x4c2   :  { %1082 = vmatprep.subr.bf16.mxu0 %v1219_v15 }
 0x4c5   :  { %1083 = vmatpush3.bf16.msra.mxu0 %v1146_v30 }
 0x57b   :  { %v247_v34 = vpop.f32.mrb[8].mxu0 }
 0x57c   :  { %v1034_v35 = vpop.f32.mrb[9].mxu0 }
 0x57d   :  { %v250_v36 = vpop.f32.mrb[10].mxu0  ;;  %v1151_v35 = vld [vmem:[%s1478_s2 + $0x30] sm:$0xff]  }
 0x57e   :  { %v1035_v38 = vpop.f32.mrb[11].mxu0 }
 0x583   :  { %v368_v39 = vpop.f32.mrb[12].mxu0 }
 0x584   :  { %v1046_v40 = vpop.f32.mrb[13].mxu0 }
 0x585   :  { %v371_v41 = vpop.f32.mrb[14].mxu0 }
 0x586   :  { %v1126_v43 = vpack.i.bf16 %v371_v41, %v368_v39  ;;  %v1047_v44 = vpop.f32.mrb[15].mxu0 }
 0x588   :  { %1127 = vrot.lane.b32.xlu1 %v1126_v43, %s1232_s17 }
 0x58b   :  { %v489_v45 = vpop.f32.mrb[16].mxu0 }
 0x58c   :  { %v1058_v46 = vpop.f32.mrb[17].mxu0 }
 0x58d   :  { %v492_v48 = vpop.f32.mrb[18].mxu0  ;;  %v967_v46 = vld [vmem:[%s1479_s3 + $0x2] ss:$0 sm:$0xff] }
 0x58e   :  { %v1131_v49 = vpack.i.bf16 %v492_v48, %v489_v45  ;;  %v1059_v50 = vpop.f32.mrb[19].mxu0 }
 0x58f   :  { %v968_v50 = vld [vmem:[%s1479_s3 + $0x3] ss:$0 sm:$0xff] }
 0x590   :  { %1132 = vrot.lane.b32.xlu0 %v1131_v49, %s1233_s19 }
 0x593   :  { %v610_v51 = vpop.f32.mrb[20].mxu0 }
 0x594   :  { %v1070_v52 = vpop.f32.mrb[21].mxu0 }
 0x595   :  { %v613_v53 = vpop.f32.mrb[22].mxu0 }
 0x596   :  { %v1136_v54 = vpack.i.bf16 %v613_v53, %v610_v51  ;;  %v1071_v55 = vpop.f32.mrb[23].mxu0 }
 0x597   :  { %v1153_v55 = vld [vmem:[%s1478_s2 + $0x40] sm:$0xff]  }
 0x598   :  { %1137 = vrot.lane.b32.xlu1 %v1136_v54, %s1234_s20 }
 0x5fa   :  { %v1128_v56 = vpop.permute.xlu1 %1127 }
 0x5fb   :  { %v1130_v58 = vunpack.i.h.bf16 %v1128_v56  ;;  %v1129_v59 = vunpack.i.l.bf16 %v1128_v56  ;;  %v1154_v56 = vld [vmem:[%s1478_s2 + $0x48] sm:$0xff]  }
 0x5fd   :  { %v642_v63 = vsel %vm135_vm2, %v250_v36, %v1130_v58  ;;  %v641_v2 = vsel %vm135_vm2, %v247_v34, %v1129_v59  ;;  %v1150_v34 = vld [vmem:[%s1478_s2 + $0x28] sm:$0xff]   ;;  %v1152_v36 = vld [vmem:[%s1478_s2 + $0x38] sm:$0xff]   ;;  %s1235_s2 = smov [#allocation2]  }
 0x5fe   :  { %s939_s24 = sshll.u32 %s1235_s2, 4  ;;  %s940_s24 = int_to_ptr.vmem [resolvable:$true] %s939_s24 }
 0x5ff   :  { %s1195_s25 = scalar_lea.vmem %s940_s24, 256  ;;  %p1200_p1 = scmp.lt.s32.totalorder %s940_s24, %s940_s24 }
 0x600   :  { %p1196_p0 = scmp.ne.s32.totalorder %s940_s24, %s1195_s25  ;;  %p1201_p2 = scmp.lt.s32.totalorder %s1195_s25, %s1195_s25 }
 0x602   :  { %v1133_v57 = vpop.permute.xlu0 %1132  ;;  %p1202_p3 = por %p1201_p2, %p1200_p1 }
 0x603   :  { %v1135_v60 = vunpack.i.h.bf16 %v1133_v57  ;;  %v1134_v61 = vunpack.i.l.bf16 %v1133_v57  ;;  %v969_v57 = vld [vmem:[%s1479_s3 + $0x6] ss:$0 sm:$0xff] }
 0x604   :  { %p1203_p4 = pnand %p1202_p3, %p1196_p0 }
 0x605   :  { %v644_v5 = vsel %vm183_vm3, %v642_v63, %v1135_v60  ;;  %v643_v6 = vsel %vm183_vm3, %v641_v2, %v1134_v61 }
 0x60a   :  { %v1138_v62 = vpop.permute.xlu1 %1137 }
 0x60b   :  { %v1140_v3 = vunpack.i.h.bf16 %v1138_v62  ;;  %v1139_v4 = vunpack.i.l.bf16 %v1138_v62 }
 0x60d   :  { %v647_v7 = vsel %vm645_vm4, %v644_v5, %v1140_v3  ;;  %v646_v8 = vsel %vm645_vm4, %v643_v6, %v1139_v4 }
 0x60e   :  { %v652_v9 = vpack.c.bf16 %v647_v7, %v646_v8 }
 0x610   :  { %1077 = vmatmul.mubr.msk.bf16.vlgmr.msra.gmra.mrb[12].mxu1 %vm30_vm0, %v652_v9 }
 0x611   :  { %1104 = vmatprep.mubr.msk.bf16.mxu1 %vm1220_vm1, %v1219_v15  ;;  %1089 = vmatpush3.bf16.msra.mxu1 %v1147_v31 }
 0x612   :  { %1090 = vmatprep.subr.bf16.mxu1 %v1219_v15 }
 0x615   :  { %1091 = vmatpush3.bf16.msra.mxu1 %v1148_v32 }
 0x616   :  { %1092 = vmatprep.subr.bf16.mxu1 %v1219_v15 }
 0x619   :  { %1093 = vmatpush3.bf16.msra.mxu1 %v1149_v33 }
 0x61a   :  { %1094 = vmatprep.subr.bf16.mxu1 %v1219_v15 }
 0x61d   :  { %1095 = vmatpush3.bf16.msra.mxu1 %v1150_v34 }
 0x61e   :  { %1096 = vmatprep.subr.bf16.mxu1 %v1219_v15 }
 0x621   :  { %1097 = vmatpush3.bf16.msra.mxu1 %v1151_v35 }
 0x622   :  { %1098 = vmatprep.subr.bf16.mxu1 %v1219_v15 }
 0x625   :  { %1099 = vmatpush3.bf16.msra.mxu1 %v1152_v36 }
 0x626   :  { %1100 = vmatprep.subr.bf16.mxu1 %v1219_v15 }
 0x629   :  { %1101 = vmatpush3.bf16.msra.mxu1 %v1153_v55 }
 0x62a   :  { %1102 = vmatprep.subr.bf16.mxu1 %v1219_v15  ;;  %v973_v15 = vld [vmem:[%s1479_s3 + $0x5] ss:$0 sm:$0xff] }
 0x62d   :  { %1103 = vmatpush3.bf16.msra.mxu1 %v1154_v56 }
 0x6e3   :  { %v706_v11 = vpop.f32.mrb[12].mxu1 }
 0x6e4   :  { %v707_v12 = vadd.f32 %v963_v10, %v706_v11  ;;  %v1078_v13 = vpop.f32.mrb[13].mxu1 }
 0x6e5   :  { %v709_v37 = vpop.f32.mrb[14].mxu1 }
 0x6e6   :  { %v1395_v14 = vadd.f32 %v707_v12, %v1265_v0  ;;  %v710_v16 = vadd.f32 %v963_v10, %v709_v37  ;;  %v1079_v17 = vpop.f32.mrb[15].mxu1 }
 0x6e8   :  { %v1398_v18 = vadd.f32 %v710_v16, %v1270_v1  ;;  %v715_v19 = vsel %vm30_vm0, %v1395_v14, 0.0 }
 0x6e9   :  { %716 = vadd.xlane.f32.xlu0 %v715_v19 }
 0x6ea   :  { %v718_v20 = vsel %vm30_vm0, %v1398_v18, 0.0 }
 0x6eb   :  { %719 = vadd.xlane.f32.xlu1 %v718_v20 }
 0x776   :  { %v717_v21 = vpop.xlane.xlu0 %716 }
 0x777   :  { %v721_v22 = vmul.f32 0.03125, %v717_v21 }
 0x778   :  { %v720_v23 = vpop.xlane.xlu1 %719 }
 0x779   :  { %v723_v24 = vsub.f32 %v1395_v14, %v721_v22  ;;  %v722_v0 = vmul.f32 0.03125, %v720_v23 }
 0x77b   :  { %v724_v25 = vsub.f32 %v1398_v18, %v722_v0  ;;  %v725_v26 = vmul.f32 %v723_v24, %v723_v24 }
 0x77d   :  { %v727_v1 = vsel %vm30_vm0, %v725_v26, 0.0  ;;  %v726_v27 = vmul.f32 %v724_v25, %v724_v25 }
 0x77e   :  { %728 = vadd.xlane.f32.xlu0 %v727_v1 }
 0x77f   :  { %v730_v28 = vsel %vm30_vm0, %v726_v27, 0.0 }
 0x782   :  { %731 = vadd.xlane.f32.xlu0 %v730_v28 }
 0x80b   :  { %v729_v38 = vpop.xlane.xlu0 %728 }
 0x80c   :  { %v733_v39 = vmul.f32 0.03125, %v729_v38 }
 0x80e   :  { %v735_v40 = vadd.f32 1e-05, %v733_v39 }
 0x80f   :  { %v732_v41 = vpop.xlane.xlu0 %731 }
 0x810   :  { %1191 = vrsqrt.f32 %v735_v40  ;;  %v734_v42 = vmul.f32 0.03125, %v732_v41 }
 0x812   :  { %v736_v43 = vadd.f32 1e-05, %v734_v42 }
 0x814   :  { %1193 = vrsqrt.f32 %v736_v43 }
 0x81a   :  { %v1192_v44 = vpop.eup %1191 }
 0x81b   :  { %v739_v45 = vmul.f32 %v1192_v44, %v723_v24 }
 0x81d   :  { %v745_v48 = vmul.f32 %v967_v46, %v739_v45 }
 0x81e   :  { %v1194_v47 = vpop.eup %1193 }
 0x81f   :  { %v740_v49 = vmul.f32 %v1194_v47, %v724_v25  ;;  %v751_v52 = vadd.f32 %v968_v50, %v745_v48 }
 0x821   :  { %v746_v51 = vmul.f32 %v967_v46, %v740_v49 }
 0x823   :  { %v752_v53 = vadd.f32 %v968_v50, %v746_v51 }
 0x825   :  { %v757_v54 = vpack.c.bf16 %v752_v53, %v751_v52 }
 0x827   :  { %1085 = vmatmul.mubr.msk.bf16.vlgmr.msra.gmra.mrb[24].mxu0 %vm30_vm0, %v757_v54 }
 0x8fa   :  { %v811_v58 = vpop.f32.mrb[24].mxu0 }
 0x8fb   :  { %v812_v59 = vadd.f32 %v969_v57, %v811_v58  ;;  %v1086_v60 = vpop.f32.mrb[25].mxu0 }
 0x8fc   :  { %v814_v61 = vpop.f32.mrb[26].mxu0 }
 0x8fd   :  { %v815_v62 = vadd.f32 %v969_v57, %v814_v61  ;;  %v1087_v63 = vpop.f32.mrb[27].mxu0  ;;  %v818_v2 = vmax.f32 %v812_v59, 0.0 }
 0x8ff   :  { %v819_v3 = vmax.f32 %v815_v62, 0.0 }
 0x901   :  { %v836_v4 = vpack.c.bf16 %v819_v3, %v818_v2 }
 0x903   :  { %1105 = vmatmul.mubr.bf16.vlgmr.msra.gmra.mrb[16].mxu1 %v836_v4 }
 0x9d6   :  { %v923_v5 = vpop.f32.mrb[16].mxu1 }
 0x9d7   :  { %v924_v6 = vadd.f32 %v973_v15, %v923_v5  ;;  %v1106_v7 = vpop.f32.mrb[17].mxu1 }
 0x9d8   :  { %v926_v8 = vpop.f32.mrb[18].mxu1 }
 0x9d9   :  { %v930_v9 = vadd.f32 %v924_v6, %v1395_v14  ;;  %v927_v10 = vadd.f32 %v973_v15, %v926_v8  ;;  %v1107_v11 = vpop.f32.mrb[19].mxu1 }
 0x9db   :  { %932 = vst.msk [vmem:[#allocation2] sm:$0xff] %vm30_vm0, %v930_v9  ;;  %v931_v12 = vadd.f32 %v927_v10, %v1398_v18 }
 0x9dd   :  { %933 = vst.msk [vmem:[#allocation2 + $0x8] sm:$0xff] %vm30_vm0, %v931_v12 }
 0x9de   :  { %1206 = shalt.err (!%p1203_p4)
}
 0x9df   :  { %s1207_s27 = scalar_lea.hbm %s1480_s4, 256 }
 0x9e0   :  { %p1208_p5 = scmp.ne.s32.totalorder %s1480_s4, %s1207_s27  ;;  %p1211_p6 = scmp.lt.u32.totalorder %s1207_s27, %s1480_s4 }
 0x9e2   :  { %p1213_p7 = pnand %p1211_p6, %p1208_p5 }
 0x9e4   :  { %1216 = shalt.err (!%p1213_p7)
}
 0x9e5   :  { %s1236_s6 = smov 128  }
 0x9e6   :  { %945 = dma.vmem_to_hbm [thread:$0]  %s940_s24, 256, %s1480_s4, [#allocation3], %s1236_s6, %s1236_s6, %s1232_s17  }
 0x9e7   :  { %1217 = dma.done.wait [#allocation3], 256  }
 0x9e8   :  { %1218 = vsyncadd [#allocation3], 4294967040 }
 0x9e9   :  { %949 = vsyncpa [#allocation3], 1 }

</bundles_post_ra>
